<compile_context>
chip_gen: v7x
topology: tpu7x:2x2x1
jax: 0.10.0
libtpu: 0.0.40
codegen_flags: <defaults>
</compile_context>

<pallas_src>
import functools
import math

import jax
import jax.numpy as jnp
import numpy as np
from jax import lax
from jax.experimental import pallas as pl
from jax.experimental.pallas import tpu as pltpu

LEAKY_SLOPE = 0.2      # benchmark MLP uses LeakyReLU(negative_slope=0.2)
NEG = -1e30            # "-inf" for the masked max (kept finite for safety)


# ---------------------------------------------------------------------------
# Kernel 1: fused per-point projection (layer-1 factorisation)
#   a = x @ W1x + pos @ W1p + b1     (source-side part of MLP layer 1)
#   q = pos @ W1p                    (target-side part of MLP layer 1)
# ---------------------------------------------------------------------------
def _proj_kernel(x_ref, pos_ref, wx_ref, wp_ref, b1_ref, a_ref, q_ref):
    q = jnp.dot(pos_ref[...], wp_ref[...], preferred_element_type=jnp.float32)
    a = jnp.dot(x_ref[...], wx_ref[...], preferred_element_type=jnp.float32)
    a_ref[...] = a + q + b1_ref[...]
    q_ref[...] = q


def _source_target_projection(x, pos, w1x, w1p, b1, tile_n=128):
    n, cin = x.shape
    h = w1x.shape[1]
    out_sds = jax.ShapeDtypeStruct((n, h), jnp.float32)
    return pl.pallas_call(
        _proj_kernel,
        out_shape=(out_sds, out_sds),
        grid_spec=pltpu.PrefetchScalarGridSpec(
            num_scalar_prefetch=0,
            grid=(n // tile_n,),
            in_specs=[
                pl.BlockSpec((tile_n, cin), lambda i: (i, 0)),
                pl.BlockSpec((tile_n, 3), lambda i: (i, 0)),
                pl.BlockSpec((cin, h), lambda i: (0, 0)),
                pl.BlockSpec((3, h), lambda i: (0, 0)),
                pl.BlockSpec((1, h), lambda i: (0, 0)),
            ],
            out_specs=[
                pl.BlockSpec((tile_n, h), lambda i: (i, 0)),
                pl.BlockSpec((tile_n, h), lambda i: (i, 0)),
            ],
        ),
        compiler_params=pltpu.CompilerParams(dimension_semantics=("parallel",)),
    )(x, pos, w1x, w1p, b1.reshape(1, -1))


# ---------------------------------------------------------------------------
# Kernel 2: pairwise PointConv (radius+batch mask, per-edge MLP, masked max aggregation)
# ---------------------------------------------------------------------------
def _pointconv_kernel(tmin_ref, tmax_ref, smin_ref, smax_ref,       # scalar prefetch
                      q_ref, pt_ref, bt_ref,                        # targets (TI, .)
                      a_ref, ps_ref, bs_ref,                        # sources (TJ, .)
                      w2_ref, b2_ref, s2_ref, t2_ref,               # layer-2 params
                      out_ref, acc_ref, *, r2, jb):
    it = pl.program_id(0)
    jt = pl.program_id(1)

    @pl.when(jt == 0)
    def _():
        acc_ref[...] = jnp.full(acc_ref.shape, NEG, acc_ref.dtype)

    # Skip tile pairs whose target/source batch-id ranges cannot overlap
    # (cross-batch tiles for sorted batches, and fully padded tiles).
    has_pair = jnp.logical_and(tmax_ref[it] >= smin_ref[jt],
                               smax_ref[jt] >= tmin_ref[it])

    @pl.when(has_pair)
    def _():
        q = q_ref[...]            # (TI, H)   target-side layer-1 contribution
        pt = pt_ref[...]          # (TI, 3)   target positions
        bt = bt_ref[...]          # (TI, 1)   target batch id
        w2 = w2_ref[...]          # (H, H)    (BN1 folded in)
        b2 = b2_ref[...]          # (1, H)
        s2 = s2_ref[...]          # (1, H)    eval-mode BN2 scale
        t2 = t2_ref[...]          # (1, H)    eval-mode BN2 shift
        ti, h = q.shape
        tj = a_ref.shape[0]

        def chunk(c, acc):
            j0 = pl.multiple_of(c * jb, jb)
            a_c = a_ref[pl.ds(j0, jb), :]           # (JB, H)  source layer-1 contribution
            ps_c = ps_ref[pl.ds(j0, jb), :]         # (JB, 3)
            bs_c = bs_ref[pl.ds(j0, jb), :]         # (JB, 1)
            # --- MLP layer 1:  leaky_relu(a_j - q_i)  (BN1 folded into w2/b2) ---
            h1 = a_c[:, None, :] - q[None, :, :]    # (JB, TI, H)
            h1 = jnp.where(h1 >= 0.0, h1, LEAKY_SLOPE * h1)
            # --- MLP layer 2 on the whole chunk: one MXU matmul, + LeakyReLU + BN2 ---
            h2 = jnp.dot(h1.reshape(jb * ti, h), w2,
                         preferred_element_type=jnp.float32) + b2
            h2 = jnp.where(h2 >= 0.0, h2, LEAKY_SLOPE * h2)
            h2 = (h2 * s2 + t2).reshape(jb, ti, h)
            # --- radius + same-batch edge mask for this source chunk ---
            dp = pt[None, :, :] - ps_c[:, None, :]                  # (JB, TI, 3)
            d2 = jnp.sum(dp * dp, axis=-1, keepdims=True)           # (JB, TI, 1)
            ok = (d2 <= r2) & (bt[None, :, :] == bs_c[:, None, :])  # (JB, TI, 1)
            h2 = jnp.where(ok, h2, NEG)
            # --- masked max over the chunk, folded into the running max ---
            return jnp.maximum(acc, jnp.max(h2, axis=0))

        acc_ref[...] = lax.fori_loop(0, tj // jb, chunk, acc_ref[...])

    @pl.when(jt == pl.num_programs(1) - 1)
    def _():
        out_ref[...] = acc_ref[...]


# ---------------------------------------------------------------------------
# Wrapper: SAModule.forward
# ---------------------------------------------------------------------------
def _pad_rows(arr, n_pad, value=0.0):
    n = arr.shape[0]
    if n == n_pad:
        return arr
    pad = jnp.full((n_pad - n,) + arr.shape[1:], value, arr.dtype)
    return jnp.concatenate([arr, pad], axis=0)


def sa_module_forward(params, x, pos, batch, *, r, ratio=0.5, max_num_neighbors=64,
                      tile_i=128, tile_j=128, tile_n=128, chunk_j=8):
    """SAModule.forward(x, pos, batch) -> (out, pos, batch)."""
    del ratio  # idx = arange(N) in the reference forward, so every point is a query.
    # TODO(synk): torch_cluster's max_num_neighbors cap (keep only the first K in-radius
    #             sources per query) is not enforced; the dense radius+batch mask uses
    #             all in-radius neighbours.
    del max_num_neighbors
    assert tile_j % chunk_j == 0

    n = pos.shape[0]
    h = params["w2"].shape[0]
    mult = int(np.lcm.reduce(np.array([tile_i, tile_j, tile_n], dtype=np.int64)))
    n_pad = ((n + mult - 1) // mult) * mult

    xp = _pad_rows(x.astype(jnp.float32), n_pad)
    posp = _pad_rows(pos.astype(jnp.float32), n_pad)
    # Distinct pad ids: padded targets (-2) never match padded sources (-1), so fully
    # padded tile pairs are skipped and pad rows never create edges with real rows.
    bat_i = batch.astype(jnp.int32).reshape(-1, 1)
    bt_i = _pad_rows(bat_i, n_pad, value=-2)
    bs_i = _pad_rows(bat_i, n_pad, value=-1)
    bt_f = bt_i.astype(jnp.float32)
    bs_f = bs_i.astype(jnp.float32)

    # Per-tile batch-id ranges, scalar-prefetched into SMEM for the tile-skip predicate.
    tmin = jnp.min(bt_i.reshape(n_pad // tile_i, tile_i), axis=1)
    tmax = jnp.max(bt_i.reshape(n_pad // tile_i, tile_i), axis=1)
    smin = jnp.min(bs_i.reshape(n_pad // tile_j, tile_j), axis=1)
    smax = jnp.max(bs_i.reshape(n_pad // tile_j, tile_j), axis=1)

    # Fused per-point projection (one Pallas kernel, one HBM round trip).
    a, q = _source_target_projection(xp, posp, params["w1x"], params["w1p"],
                                     params["b1"], tile_n)

    # Fold eval-mode BN1 (per-channel affine applied after LeakyReLU) into Linear 2.
    w2f = (params["bn1_scale"][:, None] * params["w2"]).astype(jnp.float32)
    b2f = (jnp.matmul(params["bn1_shift"], params["w2"],
                      precision=jax.lax.Precision.HIGHEST)
           + params["b2"]).reshape(1, -1).astype(jnp.float32)
    s2 = params["bn2_scale"].reshape(1, -1).astype(jnp.float32)
    t2 = params["bn2_shift"].reshape(1, -1).astype(jnp.float32)

    kernel = functools.partial(_pointconv_kernel, r2=float(r) * float(r), jb=chunk_j)
    out = pl.pallas_call(
        kernel,
        out_shape=jax.ShapeDtypeStruct((n_pad, h), jnp.float32),
        grid_spec=pltpu.PrefetchScalarGridSpec(
            num_scalar_prefetch=4,
            grid=(n_pad // tile_i, n_pad // tile_j),
            in_specs=[
                pl.BlockSpec((tile_i, h), lambda i, j, *_: (i, 0)),   # q     (targets)
                pl.BlockSpec((tile_i, 3), lambda i, j, *_: (i, 0)),   # pos   (targets)
                pl.BlockSpec((tile_i, 1), lambda i, j, *_: (i, 0)),   # batch (targets)
                pl.BlockSpec((tile_j, h), lambda i, j, *_: (j, 0)),   # a     (sources)
                pl.BlockSpec((tile_j, 3), lambda i, j, *_: (j, 0)),   # pos   (sources)
                pl.BlockSpec((tile_j, 1), lambda i, j, *_: (j, 0)),   # batch (sources)
                pl.BlockSpec((h, h), lambda i, j, *_: (0, 0)),        # W2 (BN1 folded)
                pl.BlockSpec((1, h), lambda i, j, *_: (0, 0)),        # b2 (BN1 folded)
                pl.BlockSpec((1, h), lambda i, j, *_: (0, 0)),        # BN2 scale
                pl.BlockSpec((1, h), lambda i, j, *_: (0, 0)),        # BN2 shift
            ],
            out_specs=pl.BlockSpec((tile_i, h), lambda i, j, *_: (i, 0)),
            scratch_shapes=[pltpu.VMEM((tile_i, h), jnp.float32)],
        ),
        compiler_params=pltpu.CompilerParams(
            dimension_semantics=("parallel", "arbitrary")),
    )(tmin, tmax, smin, smax, q, posp, bt_f, a, posp, bs_f, w2f, b2f, s2, t2)

    return out[:n], pos, batch


# ---------------------------------------------------------------------------
# Pure-JAX reference (dense, follows the PyTorch module directly)
# ---------------------------------------------------------------------------
def sa_module_reference(params, x, pos, batch, *, r):
    n, cin = x.shape
    w1 = jnp.concatenate([params["w1x"], params["w1p"]], axis=0)   # concat([x_j, dpos])
    dpos = pos[None, :, :] - pos[:, None, :]                        # [i, j] = pos_j - pos_i
    xj = jnp.broadcast_to(x[None, :, :], (n, n, cin))
    msg = jnp.concatenate([xj, dpos], axis=-1)                      # (N, N, cin+3)
    hmid = jnp.matmul(msg, w1, precision=jax.lax.Precision.HIGHEST) + params["b1"]
    hmid = jnp.where(hmid >= 0.0, hmid, LEAKY_SLOPE * hmid)
    hmid = hmid * params["bn1_scale"] + params["bn1_shift"]
    hout = jnp.matmul(hmid, params["w2"], precision=jax.lax.Precision.HIGHEST) + params["b2"]
    hout = jnp.where(hout >= 0.0, hout, LEAKY_SLOPE * hout)
    hout = hout * params["bn2_scale"] + params["bn2_shift"]
    d2 = jnp.sum(dpos * dpos, axis=-1)
    valid = (d2 <= r * r) & (batch[:, None] == batch[None, :])
    hout = jnp.where(valid[:, :, None], hout, NEG)
    return jnp.max(hout, axis=1), pos, batch


# ---------------------------------------------------------------------------
# Deterministic synthetic parameters for local_nn = MLP([in+3, H, H])
# ---------------------------------------------------------------------------
def init_params(key, in_channels, hidden):
    keys = jax.random.split(key, 9)

    def w(k, shape, scale=0.2):
        return scale * jax.random.normal(k, shape, dtype=jnp.float32)

    return dict(
        # Lin(in+3 -> H), split along the concat([x_j, pos_j - pos_i]) input axis
        w1x=w(keys[0], (in_channels, hidden)),
        w1p=w(keys[1], (3, hidden)),
        b1=w(keys[2], (hidden,)),
        # eval-mode BN1 affine (gamma/sqrt(var+eps), beta - mean*scale)
        bn1_scale=1.0 + 0.1 * jax.random.normal(keys[3], (hidden,), jnp.float32),
        bn1_shift=0.1 * jax.random.normal(keys[4], (hidden,), jnp.float32),
        # Lin(H -> H)
        w2=w(keys[5], (hidden, hidden), scale=1.0 / math.sqrt(hidden)),
        b2=w(keys[6], (hidden,)),
        # eval-mode BN2 affine
        bn2_scale=1.0 + 0.1 * jax.random.normal(keys[7], (hidden,), jnp.float32),
        bn2_shift=0.1 * jax.random.normal(keys[8], (hidden,), jnp.float32),
    )


if __name__ == "__main__":
    N, CIN, H = 300, 16, 64          # N deliberately not a tile multiple (exercises padding)
    RADIUS, RATIO, MAX_NEIGHBORS = 1.1, 0.5, 64

    key = jax.random.PRNGKey(0)
    k_pos, k_x, k_par = jax.random.split(key, 3)

    pos = 3.0 * jax.random.uniform(k_pos, (N, 3), dtype=jnp.float32)
    batch = jnp.concatenate([jnp.zeros((180,), jnp.int32),
                             jnp.ones((N - 180,), jnp.int32)])
    x = jax.random.normal(k_x, (N, CIN), dtype=jnp.float32)
    params = init_params(k_par, CIN, H)

    out, pos_out, batch_out = sa_module_forward(
        params, x, pos, batch, r=RADIUS, ratio=RATIO, max_num_neighbors=MAX_NEIGHBORS)
    out = jax.block_until_ready(out)

    assert out.shape == (N, H)
    assert pos_out.shape == (N, 3) and batch_out.shape == (N,)
    assert bool(jnp.all(jnp.isfinite(out)))

    ref, _, _ = sa_module_reference(params, x, pos, batch, r=RADIUS)
    err = float(jnp.max(jnp.abs(out - ref)))
    assert err < 1e-2, f"max abs error vs reference = {err}"

    print("KERNEL_OK")
</pallas_src>

<mosaic_0001>
module attributes {stable_mosaic.version = 11 : i64} {
  func.func @_proj_kernel(%arg0: i32, %arg1: memref<128x16xf32, #tpu.memory_space<vmem>>, %arg2: memref<128x3xf32, #tpu.memory_space<vmem>>, %arg3: memref<16x64xf32, #tpu.memory_space<vmem>>, %arg4: memref<3x64xf32, #tpu.memory_space<vmem>>, %arg5: memref<1x64xf32, #tpu.memory_space<vmem>>, %arg6: memref<128x64xf32, #tpu.memory_space<vmem>>, %arg7: memref<128x64xf32, #tpu.memory_space<vmem>>) attributes {dimension_semantics = [#tpu.dimension_semantics<parallel>], iteration_bounds = array<i64: 3>, scalar_prefetch = 0 : i64, scratch_operands = 0 : i64, tpu.core_type = #tpu.core_type<tc>, window_params = [{transform_indices = @transform_0, window_bounds = array<i64: 128, 16>}, {transform_indices = @transform_1, window_bounds = array<i64: 128, 3>}, {pipeline_mode = #tpu.pipeline_mode<synchronous>, transform_indices = @transform_2, window_bounds = array<i64: 16, 64>}, {pipeline_mode = #tpu.pipeline_mode<synchronous>, transform_indices = @transform_3, window_bounds = array<i64: 3, 64>}, {pipeline_mode = #tpu.pipeline_mode<synchronous>, transform_indices = @transform_4, window_bounds = array<i64: 1, 64>}, {transform_indices = @transform_5, window_bounds = array<i64: 128, 64>}, {transform_indices = @transform_6, window_bounds = array<i64: 128, 64>}]} {
    %c0 = arith.constant 0 : index
    %c0_0 = arith.constant 0 : index
    %0 = vector.load %arg2[%c0, %c0_0] : memref<128x3xf32, #tpu.memory_space<vmem>>, vector<128x3xf32>
    %c0_1 = arith.constant 0 : index
    %c0_2 = arith.constant 0 : index
    %1 = vector.load %arg4[%c0_1, %c0_2] : memref<3x64xf32, #tpu.memory_space<vmem>>, vector<3x64xf32>
    %cst = arith.constant dense<0.000000e+00> : vector<128x64xf32>
    %2 = tpu.matmul %0, %1, %cst {dimension_numbers = #tpu.dot_dimension_numbers<[1], [0], [0], [1], [0, 0, 1, 1], [], []>} : vector<128x3xf32>, vector<3x64xf32>, vector<128x64xf32> -> vector<128x64xf32>
    %c0_3 = arith.constant 0 : index
    %c0_4 = arith.constant 0 : index
    %3 = vector.load %arg1[%c0_3, %c0_4] : memref<128x16xf32, #tpu.memory_space<vmem>>, vector<128x16xf32>
    %c0_5 = arith.constant 0 : index
    %c0_6 = arith.constant 0 : index
    %4 = vector.load %arg3[%c0_5, %c0_6] : memref<16x64xf32, #tpu.memory_space<vmem>>, vector<16x64xf32>
    %cst_7 = arith.constant dense<0.000000e+00> : vector<128x64xf32>
    %5 = tpu.matmul %3, %4, %cst_7 {dimension_numbers = #tpu.dot_dimension_numbers<[1], [0], [0], [1], [0, 0, 1, 1], [], []>} : vector<128x16xf32>, vector<16x64xf32>, vector<128x64xf32> -> vector<128x64xf32>
    %6 = arith.addf %5, %2 : vector<128x64xf32>
    %c0_8 = arith.constant 0 : index
    %c0_9 = arith.constant 0 : index
    %7 = vector.load %arg5[%c0_8, %c0_9] : memref<1x64xf32, #tpu.memory_space<vmem>>, vector<1x64xf32>
    %8 = vector.broadcast %7 : vector<1x64xf32> to vector<128x64xf32>
    %9 = arith.addf %6, %8 : vector<128x64xf32>
    %c0_10 = arith.constant 0 : index
    %c0_11 = arith.constant 0 : index
    %10 = vector.load %arg6[%c0_10, %c0_11] : memref<128x64xf32, #tpu.memory_space<vmem>>, vector<128x64xf32>
    tpu.vector_store %arg6[%c0_10, %c0_11], %9 {strides = array<i32>} : memref<128x64xf32, #tpu.memory_space<vmem>>, vector<128x64xf32>,
    %c0_12 = arith.constant 0 : index
    %c0_13 = arith.constant 0 : index
    %11 = vector.load %arg7[%c0_12, %c0_13] : memref<128x64xf32, #tpu.memory_space<vmem>>, vector<128x64xf32>
    tpu.vector_store %arg7[%c0_12, %c0_13], %2 {strides = array<i32>} : memref<128x64xf32, #tpu.memory_space<vmem>>, vector<128x64xf32>,
    return
  }
  func.func @transform_0(%arg0: i32) -> (i32, i32) {
    %c0_i32 = arith.constant 0 : i32
    %c0_i32_0 = arith.constant 0 : i32
    return %arg0, %c0_i32 : i32, i32
  }
  func.func @transform_1(%arg0: i32) -> (i32, i32) {
    %c0_i32 = arith.constant 0 : i32
    %c0_i32_0 = arith.constant 0 : i32
    return %arg0, %c0_i32 : i32, i32
  }
  func.func @transform_2(%arg0: i32) -> (i32, i32) {
    %c0_i32 = arith.constant 0 : i32
    %c0_i32_0 = arith.constant 0 : i32
    %c0_i32_1 = arith.constant 0 : i32
    return %c0_i32, %c0_i32_0 : i32, i32
  }
  func.func @transform_3(%arg0: i32) -> (i32, i32) {
    %c0_i32 = arith.constant 0 : i32
    %c0_i32_0 = arith.constant 0 : i32
    %c0_i32_1 = arith.constant 0 : i32
    return %c0_i32, %c0_i32_0 : i32, i32
  }
  func.func @transform_4(%arg0: i32) -> (i32, i32) {
    %c0_i32 = arith.constant 0 : i32
    %c0_i32_0 = arith.constant 0 : i32
    %c0_i32_1 = arith.constant 0 : i32
    return %c0_i32, %c0_i32_0 : i32, i32
  }
  func.func @transform_5(%arg0: i32) -> (i32, i32) {
    %c0_i32 = arith.constant 0 : i32
    %c0_i32_0 = arith.constant 0 : i32
    return %arg0, %c0_i32 : i32, i32
  }
  func.func @transform_6(%arg0: i32) -> (i32, i32) {
    %c0_i32 = arith.constant 0 : i32
    %c0_i32_0 = arith.constant 0 : i32
    return %arg0, %c0_i32 : i32, i32
  }
}

</mosaic_0001>

<bundles_post_ra>
// kernel: tpu_custom_call.1
= control target key start
LH: loop header
LB: loop body
LE: loop exit
PB: predicated region body
PF: predicated region fallthrough
CT: control target
= control target key end

     0   :  { %s1069_s21 = smov 0   ;;  %s1264_s0 = inlined_call_operand.vmem [shape: f32[384,16], index: 0, kind: input, shape index: {}]   ;;  %s1265_s1 = inlined_call_operand.vmem [shape: f32[384,3], index: 1, kind: input, shape index: {}]   ;;  %s1266_s2 = inlined_call_operand.vmem [shape: f32[16,64], index: 2, kind: input, shape index: {}]   ;;  %s1267_s3 = inlined_call_operand.vmem [shape: f32[3,64], index: 3, kind: input, shape index: {}]   ;;  %s1268_s4 = inlined_call_operand.vmem [shape: f32[1,64], index: 4, kind: input, shape index: {}]   ;;  %s1269_s5 = inlined_call_operand.vmem [shape: f32[384,64], index: 5, kind: output, shape index: {0}]   ;;  %s1270_s6 = inlined_call_operand.vmem [shape: f32[384,64], index: 6, kind: output, shape index: {1}]  }
   0x1 LB: > { %s876_s22 = sadd.s32 4294967295, %s1032_s21   ;;  %p880_p0 = scmp.ge.s32.totalorder %s1032_s21, 1  ;;  %s1032_s21 = sphi %s1069_s21, %s17_s21  }
   0x2   : > { %p227_p1 = scmp.lt.s32.totalorder %s1032_s21, 4 }
   0x4   : > { %p228_p2 = pnand %p880_p0, %p227_p1 }
   0x5   : > { %v522_v0 = vld [vmem:[%s1266_s2] sm:$0xff] (!%p228_p2)  ;;  %v523_v1 = vld [vmem:[%s1266_s2 + $0x8] sm:$0xff] (!%p228_p2)  ;;  %vm357_vm0 = vcmask (!%p228_p2), 1042432   ;;  %s881_s29 = sshll.u32 (!%p228_p2), %s876_s22, 4  ;;  %vm308_vm1 = vcmask (!%p228_p2), 23552   ;;  %vm524_vm2 = vcmask (!%p228_p2), 130048  }
   0x6   : > { %231 = sbr.rel (%p228_p2) target bundleno = 265 (0x109), region = 40  ;;  %v307_v2 = vld [vmem:[%s1267_s3] sm:$0x7] (!%p228_p2)  ;;  %v1014_v3 = vpack.c.bf16 (!%p228_p2), %v523_v1, %v522_v0  ;;  %p268_p3 = scmp.lt.s32.totalorder (!%p228_p2), %s881_s29, 47  ;;  %vm741_vm3 = vcmask (!%p228_p2), 523264  }
   0x7   : > { %960 = vmatprep.subr.msk.mxu0 (!%p228_p2), %vm357_vm0, %v307_v2  ;;  %v1173_v38 = vld [vmem:[%s1268_s4] ss:$0 sm:$0xff] (!%p228_p2) }
   0x8   : > { %961 = vmatpush3.msk.msra.mxu0 (!%p228_p2), %vm357_vm0, %v307_v2  ;;  %1015 = vmatprep.subr.bf16.mxu1 (!%p228_p2), %v1014_v3 }
   0x9   : > { %1017 = vmatpush3.bf16.msra.mxu1 (!%p228_p2), %v1014_v3 }
   0xd   : > { %s1272_s29 = smov (!%p268_p3, %s881_s29), 47 }
   0xe   : > { %s1086_s30 = sshll.u32 %s1272_s29, 3 }
   0xf   : > { %s1092_s9 = scalar_lea.vmem %s1265_s1, %s1086_s30  ;;  %s1098_s12 = scalar_lea.vmem %s1264_s0, %s1086_s30 }
  0x10   : > { %v291_v4 = vld [vmem:[%s1092_s9] sm:$0xff]  ;;  %v292_v6 = vld [vmem:[%s1092_s9 + $0x8] sm:$0xff]  ;;  %v293_v8 = vld [vmem:[%s1092_s9 + $0x10] sm:$0xff]  ;;  %s1168_s15 = scalar_lea.vmem %s1270_s6, %s1086_s30  ;;  %s1181_s20 = scalar_lea.vmem %s1269_s5, %s1086_s30 }
  0x11   : > { %v506_v5 = vld [vmem:[%s1098_s12] sm:$0xff]  ;;  %962 = vmatprep.mubr.msk.f32.mxu0 %vm308_vm1, %v291_v4  ;;  %v507_v7 = vld [vmem:[%s1098_s12 + $0x8] sm:$0xff]  ;;  %v508_v9 = vld [vmem:[%s1098_s12 + $0x10] sm:$0xff] }
  0x12   : > { %990 = vmatprep.mubr.msk.f32.mxu1 %vm524_vm2, %v506_v5  ;;  %963 = vmatmul.mubr.msk.f32.vlgmr.msra.gmra.mrb[0].mxu0 %vm308_vm1, %v292_v6  ;;  %v294_v10 = vld [vmem:[%s1092_s9 + $0x18] sm:$0xff]  ;;  %v295_v12 = vld [vmem:[%s1092_s9 + $0x20] sm:$0xff]  ;;  %v296_v14 = vld [vmem:[%s1092_s9 + $0x28] sm:$0xff] }
  0x13   : > { %991 = vmatmul.mubr.msk.f32.vlgmr.msra.gmra.mrb[0].mxu1 %vm524_vm2, %v507_v7  ;;  %965 = vmatprep.mubr.msk.f32.mxu0 %vm308_vm1, %v293_v8  ;;  %v509_v11 = vld [vmem:[%s1098_s12 + $0x18] sm:$0xff]  ;;  %v510_v13 = vld [vmem:[%s1098_s12 + $0x20] sm:$0xff]  ;;  %v511_v15 = vld [vmem:[%s1098_s12 + $0x28] sm:$0xff] }
  0x14   : > { %993 = vmatprep.mubr.msk.f32.mxu1 %vm524_vm2, %v508_v9  ;;  %v297_v16 = vld [vmem:[%s1092_s9 + $0x30] sm:$0xff]  ;;  %v298_v18 = vld [vmem:[%s1092_s9 + $0x38] sm:$0xff]  ;;  %v299_v20 = vld [vmem:[%s1092_s9 + $0x40] sm:$0xff] }
  0x15   : > { %v512_v17 = vld [vmem:[%s1098_s12 + $0x30] sm:$0xff]  ;;  %v513_v19 = vld [vmem:[%s1098_s12 + $0x38] sm:$0xff]  ;;  %v514_v21 = vld [vmem:[%s1098_s12 + $0x40] sm:$0xff] }
  0x16   : > { %966 = vmatmul.mubr.msk.f32.gmra.mrb[2].mxu0 %vm308_vm1, %v294_v10  ;;  %v300_v22 = vld [vmem:[%s1092_s9 + $0x48] sm:$0xff]  ;;  %v301_v24 = vld [vmem:[%s1092_s9 + $0x50] sm:$0xff]  ;;  %v302_v26 = vld [vmem:[%s1092_s9 + $0x58] sm:$0xff] }
  0x17   : > { %994 = vmatmul.mubr.msk.f32.gmra.mrb[2].mxu1 %vm524_vm2, %v509_v11  ;;  %968 = vmatprep.mubr.msk.f32.mxu0 %vm308_vm1, %v295_v12  ;;  %v515_v23 = vld [vmem:[%s1098_s12 + $0x48] sm:$0xff]  ;;  %v516_v25 = vld [vmem:[%s1098_s12 + $0x50] sm:$0xff]  ;;  %v517_v27 = vld [vmem:[%s1098_s12 + $0x58] sm:$0xff] }
  0x18   : > { %996 = vmatprep.mubr.msk.f32.mxu1 %vm524_vm2, %v510_v13  ;;  %v303_v28 = vld [vmem:[%s1092_s9 + $0x60] sm:$0xff]  ;;  %v304_v30 = vld [vmem:[%s1092_s9 + $0x68] sm:$0xff]  ;;  %v305_v32 = vld [vmem:[%s1092_s9 + $0x70] sm:$0xff] }
  0x19   : > { %v518_v29 = vld [vmem:[%s1098_s12 + $0x60] sm:$0xff]  ;;  %v519_v31 = vld [vmem:[%s1098_s12 + $0x68] sm:$0xff]  ;;  %v520_v33 = vld [vmem:[%s1098_s12 + $0x70] sm:$0xff] }
  0x1a   : > { %969 = vmatmul.mubr.msk.f32.gmra.mrb[4].mxu0 %vm308_vm1, %v296_v14  ;;  %v306_v34 = vld [vmem:[%s1092_s9 + $0x78] sm:$0xff] }
  0x1b   : > { %997 = vmatmul.mubr.msk.f32.gmra.mrb[4].mxu1 %vm524_vm2, %v511_v15  ;;  %971 = vmatprep.mubr.msk.f32.mxu0 %vm308_vm1, %v297_v16  ;;  %v521_v35 = vld [vmem:[%s1098_s12 + $0x78] sm:$0xff] }
  0x1c   : > { %999 = vmatprep.mubr.msk.f32.mxu1 %vm524_vm2, %v512_v17 }
  0x1e   : > { %972 = vmatmul.mubr.msk.f32.gmra.mrb[6].mxu0 %vm308_vm1, %v298_v18 }
  0x1f   : > { %1000 = vmatmul.mubr.msk.f32.gmra.mrb[6].mxu1 %vm524_vm2, %v513_v19  ;;  %974 = vmatprep.mubr.msk.f32.mxu0 %vm308_vm1, %v299_v20 }
  0x20   : > { %1002 = vmatprep.mubr.msk.f32.mxu1 %vm524_vm2, %v514_v21 }
  0x22   : > { %975 = vmatmul.mubr.msk.f32.gmra.mrb[8].mxu0 %vm308_vm1, %v300_v22 }
  0x23   : > { %1003 = vmatmul.mubr.msk.f32.gmra.mrb[8].mxu1 %vm524_vm2, %v515_v23  ;;  %977 = vmatprep.mubr.msk.f32.mxu0 %vm308_vm1, %v301_v24 }
  0x24   : > { %1005 = vmatprep.mubr.msk.f32.mxu1 %vm524_vm2, %v516_v25 }
  0x26   : > { %978 = vmatmul.mubr.msk.f32.gmra.mrb[10].mxu0 %vm308_vm1, %v302_v26 }
  0x27   : > { %1006 = vmatmul.mubr.msk.f32.gmra.mrb[10].mxu1 %vm524_vm2, %v517_v27  ;;  %980 = vmatprep.mubr.msk.f32.mxu0 %vm308_vm1, %v303_v28 }
  0x28   : > { %1008 = vmatprep.mubr.msk.f32.mxu1 %vm524_vm2, %v518_v29 }
  0x2a   : > { %981 = vmatmul.mubr.msk.f32.gmra.mrb[12].mxu0 %vm308_vm1, %v304_v30 }
  0x2b   : > { %1009 = vmatmul.mubr.msk.f32.gmra.mrb[12].mxu1 %vm524_vm2, %v519_v31  ;;  %983 = vmatprep.mubr.msk.f32.mxu0 %vm308_vm1, %v305_v32 }
  0x2c   : > { %1011 = vmatprep.mubr.msk.f32.mxu1 %vm524_vm2, %v520_v33 }
  0x2e   : > { %984 = vmatmul.mubr.msk.f32.gmra.mrb[14].mxu0 %vm308_vm1, %v306_v34 }
  0x2f   : > { %1012 = vmatmul.mubr.msk.f32.gmra.mrb[14].mxu1 %vm524_vm2, %v521_v35 }
  0xe5   : > { %v964_v36 = vpop.f32.mrb[0].mxu0 }
  0xe6   : > { %v992_v37 = vpop.f32.mrb[0].mxu1  ;;  %759 = vst.msk [vmem:[%s1168_s15 + $0x8] sm:$0xff] %vm741_vm3, %v964_v36  ;;  %v427_v40 = vpop.f32.mrb[1].mxu0 }
  0xe7   : > { %v645_v39 = vadd.f32 %v992_v37, %v964_v36  ;;  %v639_v41 = vpop.f32.mrb[1].mxu1  ;;  %758 = vst.msk [vmem:[%s1168_s15] sm:$0xff] %vm741_vm3, %v427_v40 }
  0xe8   : > { %v640_v42 = vadd.f32 %v639_v41, %v427_v40 }
  0xe9   : > { %v726_v43 = vadd.f32 %v1173_v38, %v645_v39  ;;  %v967_v45 = vpop.f32.mrb[2].mxu0 }
  0xea   : > { %v725_v44 = vadd.f32 %v1173_v38, %v640_v42  ;;  %v995_v46 = vpop.f32.mrb[2].mxu1  ;;  %761 = vst.msk [vmem:[%s1168_s15 + $0x18] sm:$0xff] %vm741_vm3, %v967_v45  ;;  %v437_v48 = vpop.f32.mrb[3].mxu0 }
  0xeb   : > { %743 = vst.msk [vmem:[%s1181_s20 + $0x8] sm:$0xff] %vm741_vm3, %v726_v43  ;;  %v655_v47 = vadd.f32 %v995_v46, %v967_v45  ;;  %v649_v49 = vpop.f32.mrb[3].mxu1  ;;  %760 = vst.msk [vmem:[%s1168_s15 + $0x10] sm:$0xff] %vm741_vm3, %v437_v48 }
  0xec   : > { %742 = vst.msk [vmem:[%s1181_s20] sm:$0xff] %vm741_vm3, %v725_v44  ;;  %v650_v50 = vadd.f32 %v649_v49, %v437_v48 }
  0xed   : > { %v728_v51 = vadd.f32 %v1173_v38, %v655_v47  ;;  %v970_v53 = vpop.f32.mrb[4].mxu0 }
  0xee   : > { %v727_v52 = vadd.f32 %v1173_v38, %v650_v50  ;;  %v998_v54 = vpop.f32.mrb[4].mxu1  ;;  %763 = vst.msk [vmem:[%s1168_s15 + $0x28] sm:$0xff] %vm741_vm3, %v970_v53  ;;  %v447_v56 = vpop.f32.mrb[5].mxu0 }
  0xef   : > { %745 = vst.msk [vmem:[%s1181_s20 + $0x18] sm:$0xff] %vm741_vm3, %v728_v51  ;;  %v665_v55 = vadd.f32 %v998_v54, %v970_v53  ;;  %v659_v57 = vpop.f32.mrb[5].mxu1  ;;  %762 = vst.msk [vmem:[%s1168_s15 + $0x20] sm:$0xff] %vm741_vm3, %v447_v56 }
  0xf0   : > { %744 = vst.msk [vmem:[%s1181_s20 + $0x10] sm:$0xff] %vm741_vm3, %v727_v52  ;;  %v660_v58 = vadd.f32 %v659_v57, %v447_v56 }
  0xf1   : > { %v730_v59 = vadd.f32 %v1173_v38, %v665_v55  ;;  %v973_v61 = vpop.f32.mrb[6].mxu0 }
  0xf2   : > { %v729_v60 = vadd.f32 %v1173_v38, %v660_v58  ;;  %v1001_v62 = vpop.f32.mrb[6].mxu1  ;;  %765 = vst.msk [vmem:[%s1168_s15 + $0x38] sm:$0xff] %vm741_vm3, %v973_v61  ;;  %v457_v0 = vpop.f32.mrb[7].mxu0 }
  0xf3   : > { %747 = vst.msk [vmem:[%s1181_s20 + $0x28] sm:$0xff] %vm741_vm3, %v730_v59  ;;  %v675_v63 = vadd.f32 %v1001_v62, %v973_v61  ;;  %v669_v1 = vpop.f32.mrb[7].mxu1  ;;  %764 = vst.msk [vmem:[%s1168_s15 + $0x30] sm:$0xff] %vm741_vm3, %v457_v0 }
  0xf4   : > { %746 = vst.msk [vmem:[%s1181_s20 + $0x20] sm:$0xff] %vm741_vm3, %v729_v60  ;;  %v670_v2 = vadd.f32 %v669_v1, %v457_v0 }
  0xf5   : > { %v732_v3 = vadd.f32 %v1173_v38, %v675_v63  ;;  %v976_v5 = vpop.f32.mrb[8].mxu0 }
  0xf6   : > { %v731_v4 = vadd.f32 %v1173_v38, %v670_v2  ;;  %v1004_v6 = vpop.f32.mrb[8].mxu1  ;;  %767 = vst.msk [vmem:[%s1168_s15 + $0x48] sm:$0xff] %vm741_vm3, %v976_v5  ;;  %v467_v8 = vpop.f32.mrb[9].mxu0 }
  0xf7   : > { %749 = vst.msk [vmem:[%s1181_s20 + $0x38] sm:$0xff] %vm741_vm3, %v732_v3  ;;  %v685_v7 = vadd.f32 %v1004_v6, %v976_v5  ;;  %v679_v9 = vpop.f32.mrb[9].mxu1  ;;  %766 = vst.msk [vmem:[%s1168_s15 + $0x40] sm:$0xff] %vm741_vm3, %v467_v8 }
  0xf8   : > { %748 = vst.msk [vmem:[%s1181_s20 + $0x30] sm:$0xff] %vm741_vm3, %v731_v4  ;;  %v680_v10 = vadd.f32 %v679_v9, %v467_v8 }
  0xf9   : > { %v734_v11 = vadd.f32 %v1173_v38, %v685_v7  ;;  %v979_v13 = vpop.f32.mrb[10].mxu0 }
  0xfa   : > { %v733_v12 = vadd.f32 %v1173_v38, %v680_v10  ;;  %v1007_v14 = vpop.f32.mrb[10].mxu1  ;;  %769 = vst.msk [vmem:[%s1168_s15 + $0x58] sm:$0xff] %vm741_vm3, %v979_v13  ;;  %v477_v16 = vpop.f32.mrb[11].mxu0 }
  0xfb   : > { %751 = vst.msk [vmem:[%s1181_s20 + $0x48] sm:$0xff] %vm741_vm3, %v734_v11  ;;  %v695_v15 = vadd.f32 %v1007_v14, %v979_v13  ;;  %v689_v17 = vpop.f32.mrb[11].mxu1  ;;  %768 = vst.msk [vmem:[%s1168_s15 + $0x50] sm:$0xff] %vm741_vm3, %v477_v16 }
  0xfc   : > { %750 = vst.msk [vmem:[%s1181_s20 + $0x40] sm:$0xff] %vm741_vm3, %v733_v12  ;;  %v690_v18 = vadd.f32 %v689_v17, %v477_v16 }
  0xfd   : > { %v736_v19 = vadd.f32 %v1173_v38, %v695_v15  ;;  %v982_v21 = vpop.f32.mrb[12].mxu0 }
  0xfe   : > { %v735_v20 = vadd.f32 %v1173_v38, %v690_v18  ;;  %v1010_v22 = vpop.f32.mrb[12].mxu1  ;;  %771 = vst.msk [vmem:[%s1168_s15 + $0x68] sm:$0xff] %vm741_vm3, %v982_v21  ;;  %v487_v24 = vpop.f32.mrb[13].mxu0 }
  0xff   : > { %753 = vst.msk [vmem:[%s1181_s20 + $0x58] sm:$0xff] %vm741_vm3, %v736_v19  ;;  %v705_v23 = vadd.f32 %v1010_v22, %v982_v21  ;;  %v699_v25 = vpop.f32.mrb[13].mxu1  ;;  %770 = vst.msk [vmem:[%s1168_s15 + $0x60] sm:$0xff] %vm741_vm3, %v487_v24 }
 0x100   : > { %752 = vst.msk [vmem:[%s1181_s20 + $0x50] sm:$0xff] %vm741_vm3, %v735_v20  ;;  %v700_v26 = vadd.f32 %v699_v25, %v487_v24 }
 0x101   : > { %v738_v27 = vadd.f32 %v1173_v38, %v705_v23  ;;  %v985_v29 = vpop.f32.mrb[14].mxu0 }
 0x102   : > { %v737_v28 = vadd.f32 %v1173_v38, %v700_v26  ;;  %v1013_v30 = vpop.f32.mrb[14].mxu1  ;;  %773 = vst.msk [vmem:[%s1168_s15 + $0x78] sm:$0xff] %vm741_vm3, %v985_v29  ;;  %v497_v32 = vpop.f32.mrb[15].mxu0 }
 0x103   : > { %755 = vst.msk [vmem:[%s1181_s20 + $0x68] sm:$0xff] %vm741_vm3, %v738_v27  ;;  %v715_v31 = vadd.f32 %v1013_v30, %v985_v29  ;;  %v709_v33 = vpop.f32.mrb[15].mxu1  ;;  %772 = vst.msk [vmem:[%s1168_s15 + $0x70] sm:$0xff] %vm741_vm3, %v497_v32 }
 0x104   : > { %754 = vst.msk [vmem:[%s1181_s20 + $0x60] sm:$0xff] %vm741_vm3, %v737_v28  ;;  %v710_v34 = vadd.f32 %v709_v33, %v497_v32 }
 0x105   : > { %v740_v35 = vadd.f32 %v1173_v38, %v715_v31 }
 0x106   : > { %v739_v36 = vadd.f32 %v1173_v38, %v710_v34 }
 0x107   : > { %757 = vst.msk [vmem:[%s1181_s20 + $0x78] sm:$0xff] %vm741_vm3, %v740_v35 }
 0x108   : > { %756 = vst.msk [vmem:[%s1181_s20 + $0x70] sm:$0xff] %vm741_vm3, %v739_v36 }
 0x109 PF: > { %s17_s21 = sadd.s32 1, %s1032_s21  }
 0x10a   : > { %p14_p4 = scmp.ge.s32.totalorder %s17_s21, 5  }
 0x10c   :  { %16 = sbr.rel (!%p14_p4) target bundleno = 1 (0x1), region = 85 }

</bundles_post_ra>
